<compile_context>
chip_gen: v6e
topology: v6e:2x2x1
jax: 0.10.0
libtpu: 0.0.40
codegen_flags: <defaults>
</compile_context>

<pallas_src>
import jax
import jax.numpy as jnp
from jax.experimental import pallas as pl
from jax.experimental.pallas import tpu as pltpu

LANE = 128
SUBLANE = 8


def _round_up(x: int, m: int) -> int:
    return (x + m - 1) // m * m


# ----------------------------------------------------------------- kernels --

def _residual_fused_kernel(x_ref, wt_ref, b_ref, o_ref):
    """Collapsed-K path. Grid = (batch tiles,); full (Dp, Dp) W^T resident.

    x_ref : (tm, Dp)  activation tile (f32)
    wt_ref: (Dp, Dp)  pre-transposed bf16 weight (constant index -> resident)
    b_ref : (1,  Dp)  f32 bias
    o_ref : (tm, Dp)  output tile
    """
    x = x_ref[...]
    acc = jnp.dot(x.astype(wt_ref.dtype), wt_ref[...],
                  preferred_element_type=jnp.float32)
    o_ref[...] = (acc + x.astype(jnp.float32)
                  + b_ref[...].astype(jnp.float32)).astype(o_ref.dtype)


def _residual_tiled_kernel(x_ref, wt_ref, b_ref, o_ref, acc_ref):
    """Tiled path for large Dp. Grid = (i, j, k) with tn == tk.

    x_ref  : (tm, tk)  x tile, block (i, k) -- also the residual tile at k == j
    wt_ref : (tk, tn)  bf16 W^T tile, block (k, j)
    b_ref  : (1,  tn)  f32 bias tile, block (0, j)
    o_ref  : (tm, tn)  output tile, block (i, j)
    acc_ref: (tm, tn)  f32 accumulator scratch, resident over k
    """
    j = pl.program_id(1)
    k = pl.program_id(2)
    nk = pl.num_programs(2)

    @pl.when(k == 0)
    def _():
        # Fold the bias into the accumulator init (saves a VPU add later).
        acc_ref[...] = jnp.broadcast_to(
            b_ref[...].astype(jnp.float32), acc_ref.shape)

    xk = x_ref[...]
    acc_ref[...] += jnp.dot(xk.astype(wt_ref.dtype), wt_ref[...],
                            preferred_element_type=jnp.float32)

    # Because tn == tk, the x block (i, k) IS the output block (i, j) when
    # k == j: reuse it for the residual add -> x is read from HBM only once.
    @pl.when(k == j)
    def _():
        acc_ref[...] += xk.astype(jnp.float32)

    @pl.when(k == nk - 1)
    def _():
        o_ref[...] = acc_ref[...].astype(o_ref.dtype)


# ------------------------------------------------------------------ wrapper --

def prepare_residual_params(w, b, *, weight_dtype=jnp.bfloat16):
    """One-time parameter prep (NOT per forward call).

    w : (out, in) PyTorch nn.Linear weight  ->  stored as (in, out) = W.T
    b : (out,)
    The feature dim is zero-padded to a multiple of 128 (lane-dense); padded
    weight rows/cols are zero so they contribute nothing and are sliced away.
    """
    w = jnp.asarray(w)
    b = jnp.asarray(b)
    assert w.ndim == 2 and w.shape[0] == w.shape[1], (
        "Residual requires a square Linear (out_features == in_features)")
    assert b.shape == (w.shape[0],)
    d = w.shape[0]
    dp = _round_up(d, LANE)
    wt = w.T.astype(weight_dtype)           # (in, out), bf16 halves HBM traffic
    bias = b.astype(jnp.float32)
    if dp != d:
        wt = jnp.pad(wt, ((0, dp - d), (0, dp - d)))
        bias = jnp.pad(bias, (0, dp - d))
    return {"wt": wt, "b": bias.reshape(1, dp), "dim": d}


def residual_forward(x, params, *, tm: int = 512, tn: int = 512, tk: int = 512,
                     fused_vmem_budget: int = 40 * 1024 * 1024,
                     vmem_limit_bytes: int = 48 * 1024 * 1024):
    """out = x + x @ W.T + b  with a Pallas TPU kernel.

    x      : (B, D) f32
    params : output of prepare_residual_params.
    """
    B, D = x.shape
    wt, bias = params["wt"], params["b"]
    assert D == params["dim"], "input feature dim does not match the weights"
    Dp = wt.shape[0]
    w_item = jnp.dtype(wt.dtype).itemsize
    x_item = jnp.dtype(x.dtype).itemsize

    # Minimal padding only: features to a lane multiple (K-correctness: padded
    # weight rows are zero) and batch to a sublane multiple.  For the common
    # case (B % 8 == 0, D % 128 == 0) this is a no-op -> no extra HBM pass.
    Bp = _round_up(B, SUBLANE)
    x_in = x
    if Bp != B or Dp != D:
        x_in = jnp.pad(x, ((0, Bp - B), (0, Dp - D)))

    # Batch tile: as big as possible (multiple of 8).  The last batch block may
    # be partial -> handled by masked writes, no padding to a tile multiple.
    tm = max(SUBLANE, min(_round_up(tm, SUBLANE), Bp))
    nbm = pl.cdiv(Bp, tm)

    # Estimated double-buffered VMEM footprint of the collapsed-K path.
    fused_bytes = (2 * Dp * Dp * w_item        # resident W^T
                   + 2 * tm * Dp * x_item      # x tile
                   + 2 * tm * Dp * x_item      # out tile
                   + 2 * Dp * 4)               # bias
    use_fused = fused_bytes <= fused_vmem_budget

    if use_fused:
        out = pl.pallas_call(
            _residual_fused_kernel,
            out_shape=jax.ShapeDtypeStruct((Bp, Dp), x.dtype),
            grid_spec=pltpu.PrefetchScalarGridSpec(
                num_scalar_prefetch=0,
                grid=(nbm,),
                in_specs=[
                    pl.BlockSpec((tm, Dp), lambda i: (i, 0)),   # x
                    pl.BlockSpec((Dp, Dp), lambda i: (0, 0)),   # W^T (resident)
                    pl.BlockSpec((1, Dp), lambda i: (0, 0)),    # bias
                ],
                out_specs=pl.BlockSpec((tm, Dp), lambda i: (i, 0)),
            ),
            compiler_params=pltpu.CompilerParams(
                dimension_semantics=("parallel",),
                vmem_limit_bytes=vmem_limit_bytes,
            ),
            cost_estimate=pl.CostEstimate(
                flops=2 * Bp * Dp * Dp,
                transcendentals=0,
                bytes_accessed=(2 * Bp * Dp * x_item + Dp * Dp * w_item
                                + Dp * 4),
            ),
        )(x_in, wt, bias)
    else:
        # Tiled (i, j, k) path; tn == tk is required for the k == j residual
        # reuse trick.  Footprint with tm=512, tnk=512: ~6 MiB.
        tnk = min(tn, tk, Dp)
        tnk = max(LANE, (tnk // LANE) * LANE)
        while Dp % tnk:                       # Dp is a multiple of 128
            tnk -= LANE
        nbn = Dp // tnk
        grid = (nbm, nbn, nbn)

        out = pl.pallas_call(
            _residual_tiled_kernel,
            out_shape=jax.ShapeDtypeStruct((Bp, Dp), x.dtype),
            grid_spec=pltpu.PrefetchScalarGridSpec(
                num_scalar_prefetch=0,
                grid=grid,
                in_specs=[
                    pl.BlockSpec((tm, tnk), lambda i, j, k: (i, k)),   # x
                    pl.BlockSpec((tnk, tnk), lambda i, j, k: (k, j)),  # W^T
                    pl.BlockSpec((1, tnk), lambda i, j, k: (0, j)),    # bias
                ],
                out_specs=pl.BlockSpec((tm, tnk), lambda i, j, k: (i, j)),
                scratch_shapes=[pltpu.VMEM((tm, tnk), jnp.float32)],
            ),
            compiler_params=pltpu.CompilerParams(
                dimension_semantics=("parallel", "parallel", "arbitrary"),
                vmem_limit_bytes=vmem_limit_bytes,
            ),
            cost_estimate=pl.CostEstimate(
                flops=2 * Bp * Dp * Dp,
                transcendentals=0,
                bytes_accessed=(2 * Bp * Dp * x_item
                                + nbm * Dp * Dp * w_item + Dp * 4),
            ),
        )(x_in, wt, bias)

    if Bp != B or Dp != D:
        out = out[:B, :D]
    return out


if __name__ == "__main__":
    key = jax.random.PRNGKey(0)
    kx, kw, kb = jax.random.split(key, 3)

    # --- module-sized case: Residual(input_dim=32) on a small batch ---------
    B, D = 8, 32
    x = jax.random.normal(kx, (B, D), dtype=jnp.float32)
    w = jax.random.normal(kw, (D, D), dtype=jnp.float32) * 0.1   # nn.Linear (out, in)
    b = jax.random.normal(kb, (D,), dtype=jnp.float32) * 0.1

    params = prepare_residual_params(w, b)          # one-time weight prep
    out = jax.block_until_ready(residual_forward(x, params))

    ref_f32 = x + (x @ w.T + b)
    # bf16-consistent reference (same matmul precision as the kernel path):
    wt32 = params["wt"][:D, :D].astype(jnp.float32)
    ref_bf = x + jnp.dot(x.astype(jnp.bfloat16).astype(jnp.float32), wt32) + b
    assert out.shape == ref_f32.shape
    assert float(jnp.max(jnp.abs(out - ref_bf))) < 1e-2, \
        float(jnp.max(jnp.abs(out - ref_bf)))
    assert float(jnp.max(jnp.abs(out - ref_f32))) < 5e-2, \
        float(jnp.max(jnp.abs(out - ref_f32)))

    # --- larger case exercising the tiled (i, j, k) path --------------------
    B2, D2 = 256, 512
    x2 = jax.random.normal(kx, (B2, D2), dtype=jnp.float32)
    w2 = jax.random.normal(kw, (D2, D2), dtype=jnp.float32) * 0.05
    b2 = jax.random.normal(kb, (D2,), dtype=jnp.float32) * 0.1
    p2 = prepare_residual_params(w2, b2)
    out2 = jax.block_until_ready(
        residual_forward(x2, p2, tn=256, tk=256, fused_vmem_budget=0))

    wt2_32 = p2["wt"][:D2, :D2].astype(jnp.float32)
    ref2_bf = x2 + jnp.dot(x2.astype(jnp.bfloat16).astype(jnp.float32), wt2_32) + b2
    ref2_f32 = x2 + (x2 @ w2.T + b2)
    assert out2.shape == ref2_f32.shape
    assert float(jnp.max(jnp.abs(out2 - ref2_bf))) < 1e-2, \
        float(jnp.max(jnp.abs(out2 - ref2_bf)))
    assert float(jnp.max(jnp.abs(out2 - ref2_f32))) < 1e-1, \
        float(jnp.max(jnp.abs(out2 - ref2_f32)))

    print("KERNEL_OK")
</pallas_src>

<mosaic_0001>
module attributes {stable_mosaic.version = 11 : i64} {
  func.func @_residual_fused_kernel(%arg0: i32, %arg1: memref<8x128xf32, #tpu.memory_space<vmem>>, %arg2: memref<128x128xbf16, #tpu.memory_space<vmem>>, %arg3: memref<1x128xf32, #tpu.memory_space<vmem>>, %arg4: memref<8x128xf32, #tpu.memory_space<vmem>>) attributes {dimension_semantics = [#tpu.dimension_semantics<parallel>], iteration_bounds = array<i64: 1>, scalar_prefetch = 0 : i64, scratch_operands = 0 : i64, tpu.core_type = #tpu.core_type<tc>, window_params = [{transform_indices = @transform_0, window_bounds = array<i64: 8, 128>}, {pipeline_mode = #tpu.pipeline_mode<synchronous>, transform_indices = @transform_1, window_bounds = array<i64: 128, 128>}, {pipeline_mode = #tpu.pipeline_mode<synchronous>, transform_indices = @transform_2, window_bounds = array<i64: 1, 128>}, {transform_indices = @transform_3, window_bounds = array<i64: 8, 128>}]} {
    %c0 = arith.constant 0 : index
    %c0_0 = arith.constant 0 : index
    %0 = vector.load %arg1[%c0, %c0_0] : memref<8x128xf32, #tpu.memory_space<vmem>>, vector<8x128xf32>
    %1 = arith.truncf %0 : vector<8x128xf32> to vector<8x128xbf16>
    %c0_1 = arith.constant 0 : index
    %c0_2 = arith.constant 0 : index
    %2 = vector.load %arg2[%c0_1, %c0_2] : memref<128x128xbf16, #tpu.memory_space<vmem>>, vector<128x128xbf16>
    %cst = arith.constant dense<0.000000e+00> : vector<8x128xf32>
    %3 = tpu.matmul %1, %2, %cst {dimension_numbers = #tpu.dot_dimension_numbers<[1], [0], [0], [1], [0, 0, 1, 1], [], []>} : vector<8x128xbf16>, vector<128x128xbf16>, vector<8x128xf32> -> vector<8x128xf32>
    %4 = arith.addf %3, %0 : vector<8x128xf32>
    %c0_3 = arith.constant 0 : index
    %c0_4 = arith.constant 0 : index
    %5 = vector.load %arg3[%c0_3, %c0_4] : memref<1x128xf32, #tpu.memory_space<vmem>>, vector<1x128xf32>
    %6 = vector.broadcast %5 : vector<1x128xf32> to vector<8x128xf32>
    %7 = arith.addf %4, %6 : vector<8x128xf32>
    %c0_5 = arith.constant 0 : index
    %c0_6 = arith.constant 0 : index
    %8 = vector.load %arg4[%c0_5, %c0_6] : memref<8x128xf32, #tpu.memory_space<vmem>>, vector<8x128xf32>
    tpu.vector_store %arg4[%c0_5, %c0_6], %7 {strides = array<i32>} : memref<8x128xf32, #tpu.memory_space<vmem>>, vector<8x128xf32>,
    return
  }
  func.func @transform_0(%arg0: i32) -> (i32, i32) {
    %c0_i32 = arith.constant 0 : i32
    %c0_i32_0 = arith.constant 0 : i32
    return %arg0, %c0_i32 : i32, i32
  }
  func.func @transform_1(%arg0: i32) -> (i32, i32) {
    %c0_i32 = arith.constant 0 : i32
    %c0_i32_0 = arith.constant 0 : i32
    %c0_i32_1 = arith.constant 0 : i32
    return %c0_i32, %c0_i32_0 : i32, i32
  }
  func.func @transform_2(%arg0: i32) -> (i32, i32) {
    %c0_i32 = arith.constant 0 : i32
    %c0_i32_0 = arith.constant 0 : i32
    %c0_i32_1 = arith.constant 0 : i32
    return %c0_i32, %c0_i32_0 : i32, i32
  }
  func.func @transform_3(%arg0: i32) -> (i32, i32) {
    %c0_i32 = arith.constant 0 : i32
    %c0_i32_0 = arith.constant 0 : i32
    return %arg0, %c0_i32 : i32, i32
  }
}

</mosaic_0001>

<bundles_post_ra>
// kernel: tpu_custom_call.1
= control target key start
LH: loop header
LB: loop body
LE: loop exit
PB: predicated region body
PF: predicated region fallthrough
CT: control target
= control target key end

     0   :  { %8 = vsyncpa [#allocation3], 0  ;;  %s331_s0 = inlined_call_operand.hbm [shape: f32[8,128], index: 0, kind: input, shape index: {}]   ;;  %s332_s1 = inlined_call_operand.hbm [shape: bf16[128,128], index: 1, kind: input, shape index: {}]   ;;  %s333_s2 = inlined_call_operand.vmem [shape: f32[1,128], index: 2, kind: input, shape index: {}]   ;;  %s334_s3 = inlined_call_operand.hbm [shape: f32[8,128], index: 3, kind: output, shape index: {}]  }
   0x1   :  { %9 = vsyncpa [#allocation6], 0 }
   0x2   :  { %10 = vsyncpa [#allocation4], 0  ;;  %s292_s12 = smov [#allocation2]   ;;  %s293_s14 = smov [#allocation5]  }
   0x3   :  { %s17_s13 = sshll.u32 %s292_s12, 4  ;;  %s26_s15 = sshll.u32 %s293_s14, 4  ;;  %s18_s13 = int_to_ptr.vmem [resolvable:$true] %s17_s13  ;;  %s27_s15 = int_to_ptr.vmem [resolvable:$true] %s26_s15 }
   0x4   :  { %s234_s16 = scalar_lea.vmem %s18_s13, 128  ;;  %p239_p1 = scmp.lt.s32.totalorder %s18_s13, %s18_s13 }
   0x5   :  { %p235_p0 = scmp.ne.s32.totalorder %s18_s13, %s234_s16  ;;  %p240_p2 = scmp.lt.s32.totalorder %s234_s16, %s234_s16 }
   0x7   :  { %p241_p3 = por %p240_p2, %p239_p1 }
   0x9   :  { %p242_p4 = pnand %p241_p3, %p235_p0 }
   0xb   :  { %245 = shalt.err (!%p242_p4)
}
   0xc   :  { %20 = dma.hbm_to_vmem [thread:$0]  %s331_s0, 128, %s18_s13, [#allocation3]  }
   0xd   :  { %s254_s19 = scalar_lea.vmem %s27_s15, 1024  ;;  %p259_p6 = scmp.lt.s32.totalorder %s27_s15, %s27_s15 }
   0xe   :  { %p255_p5 = scmp.ne.s32.totalorder %s27_s15, %s254_s19  ;;  %p260_p7 = scmp.lt.s32.totalorder %s254_s19, %s254_s19 }
  0x10   :  { %p261_p8 = por %p260_p7, %p259_p6 }
  0x12   :  { %p262_p9 = pnand %p261_p8, %p255_p5 }
  0x14   :  { %265 = shalt.err (!%p262_p9)
}
  0x15   :  { %s294_s20 = smov 64   ;;  %s295_s21 = smov 4  }
  0x16   :  { %32 = dma.hbm_to_vmem [thread:$0]  %s332_s1, 1024, %s27_s15, [#allocation6], %s294_s20, %s294_s20, %s295_s21  }
  0x17   :  { %286 = dma.done.wait [#allocation3], 128  }
  0x18   :  { %287 = vsyncadd [#allocation3], 4294967168 }
  0x19   :  { %288 = dma.done.wait [#allocation6], 1024  }
  0x1a   :  { %289 = vsyncadd [#allocation6], 4294966272  ;;  %v296_v0 = vmov 0.0   ;;  %vm297_vm0 = vmmov 0   ;;  %v218_v1 = vld [vmem:[#allocation5 + $0x38] sm:$0xff]   ;;  %v219_v2 = vld [vmem:[#allocation5 + $0x30] sm:$0xff]  }
  0x1b   :  { %191 = vmatprep.subr.bf16.mxu0 %v296_v0  ;;  %207 = vmatprep.mubr.msk.bf16.mxu0 %vm297_vm0, %v296_v0  ;;  %v220_v3 = vld [vmem:[#allocation5 + $0x28] sm:$0xff]   ;;  %v221_v4 = vld [vmem:[#allocation5 + $0x20] sm:$0xff]   ;;  %v222_v5 = vld [vmem:[#allocation5 + $0x18] sm:$0xff]   ;;  %s298_s24 = smov [#allocation7]  }
  0x1c   :  { %192 = vmatpush3.bf16.msra.mxu0 %v218_v1  ;;  %v223_v6 = vld [vmem:[#allocation5 + $0x10] sm:$0xff]   ;;  %v224_v7 = vld [vmem:[#allocation5 + $0x8] sm:$0xff]   ;;  %v225_v8 = vld [vmem:[#allocation5] sm:$0xff]   ;;  %s163_s25 = sshll.u32 %s298_s24, 4  ;;  %s164_s25 = int_to_ptr.vmem [resolvable:$true] %s163_s25 }
  0x1d   :  { %193 = vmatprep.subr.bf16.mxu0 %v296_v0  ;;  %v42_v9 = vld [vmem:[#allocation2] sm:$0xff]  ;;  %s266_s26 = scalar_lea.vmem %s164_s25, 128  ;;  %p271_p11 = scmp.lt.s32.totalorder %s164_s25, %s164_s25 }
  0x1e   :  { %v43_v10 = vpack.c.bf16 %v42_v9, %v42_v9  ;;  %v181_v12 = vld [vmem:[%s333_s2] ss:$0 sm:$0xff]  ;;  %p267_p10 = scmp.ne.s32.totalorder %s164_s25, %s266_s26  ;;  %p272_p12 = scmp.lt.s32.totalorder %s266_s26, %s266_s26 }
  0x20   :  { %194 = vmatpush3.bf16.msra.mxu0 %v219_v2  ;;  %p273_p13 = por %p272_p12, %p271_p11 }
  0x21   :  { %195 = vmatprep.subr.bf16.mxu0 %v296_v0 }
  0x22   :  { %p274_p0 = pnand %p273_p13, %p267_p10 }
  0x24   :  { %196 = vmatpush3.bf16.msra.mxu0 %v220_v3 }
  0x25   :  { %197 = vmatprep.subr.bf16.mxu0 %v296_v0 }
  0x28   :  { %198 = vmatpush3.bf16.msra.mxu0 %v221_v4 }
  0x29   :  { %199 = vmatprep.subr.bf16.mxu0 %v296_v0 }
  0x2c   :  { %200 = vmatpush3.bf16.msra.mxu0 %v222_v5 }
  0x2d   :  { %201 = vmatprep.subr.bf16.mxu0 %v296_v0 }
  0x30   :  { %202 = vmatpush3.bf16.msra.mxu0 %v223_v6 }
  0x31   :  { %203 = vmatprep.subr.bf16.mxu0 %v296_v0 }
  0x34   :  { %204 = vmatpush3.bf16.msra.mxu0 %v224_v7 }
  0x35   :  { %205 = vmatprep.subr.bf16.mxu0 %v296_v0 }
  0x38   :  { %206 = vmatpush3.bf16.msra.mxu0 %v225_v8 }
  0x3b   :  { %208 = vmatmul.mubr.bf16.vlgmr.msra.gmra.mxu0 %v43_v10 }
  0xfb   :  { %v142_v11 = vpop.f32.mrf.mxu0 }
  0xfc   :  { %v143_v13 = vadd.f32 %v142_v11, %v42_v9 }
  0xfd   :  { %v209_v14 = vpop.f32.mrf.mxu0 }
  0xfe   :  { %v155_v15 = vadd.f32 %v181_v12, %v143_v13 }
  0xff   :  { %v145_v16 = vpop.f32.mrf.mxu0 }
 0x100   :  { %156 = vst [vmem:[#allocation7] sm:$0xff] %v155_v15 }
 0x101   :  { %v210_v17 = vpop.f32.mrf.mxu0 }
 0x102   :  { %277 = shalt.err (!%p274_p0)
}
 0x103   :  { %166 = dma.vmem_to_hbm [thread:$0]  %s164_s25, 128, %s334_s3, [#allocation4]  }
 0x104   :  { %290 = dma.done.wait [#allocation4], 128  }
 0x105   :  { %291 = vsyncadd [#allocation4], 4294967168 }
 0x106   :  { %170 = vsyncpa [#allocation3], 1 }
 0x107   :  { %171 = vsyncpa [#allocation6], 1 }
 0x108   :  { %172 = vsyncpa [#allocation4], 1 }

</bundles_post_ra>
